<compile_context>
chip_gen: v6e
topology: v6e:2x2x1
jax: 0.10.0
libtpu: 0.0.40
codegen_flags: <defaults>
</compile_context>

<pallas_src>
import functools
import itertools

import numpy as np
import jax
import jax.numpy as jnp
from jax.experimental import pallas as pl
from jax.experimental.pallas import tpu as pltpu

ANCHOR_SCALE = 4.0
STRIDES = [4, 4, 8, 16, 32]
SCALES = [2.0 ** 0, 2.0 ** (1.0 / 3.0), 2.0 ** (2.0 / 3.0)]
RATIOS = [(1.0, 1.0), (1.4, 0.7), (0.7, 1.4)]
NUM_ANCHORS = len(SCALES) * len(RATIOS)   # 9
COLS = NUM_ANCHORS * 4                    # 36


def _anchor_level_kernel(cm_ref, o_ref, *, stride):
    """Fill one row-tile of a pyramid level's (hs, ws*36) anchor slab.

    cm_ref : (2, ws*36) float32 -- row 0: 1.0 where column is a y-coordinate,
                                   row 1: x_center*(1-mask) + signed half-size
    o_ref  : (tr, ws*36) float32 output tile covering rows [i*tr, (i+1)*tr)
    """
    tr = o_ref.shape[0]
    base = pl.program_id(0) * tr
    row = jax.lax.broadcasted_iota(jnp.int32, (tr, 1), 0) + base
    yy = row.astype(jnp.float32) * float(stride) + 0.5 * float(stride)
    # (tr,1) y-centers broadcast against (1, ws*36) mask/constant -> (tr, ws*36)
    o_ref[...] = yy * cm_ref[0:1, :] + cm_ref[1:2, :]


def _level_constants(stride, ws):
    """Host precompute: (2, ws*36) [y-mask ; x/offset constant] rows."""
    width = ws * COLS
    cm = np.zeros((2, width), dtype=np.float32)
    xs = np.arange(ws, dtype=np.float64) * stride + stride / 2.0   # x centers
    cell = np.arange(ws) * COLS
    for a, (scale, ratio) in enumerate(itertools.product(SCALES, RATIOS)):
        base = ANCHOR_SCALE * stride * scale
        ax2 = base * ratio[0] / 2.0
        ay2 = base * ratio[1] / 2.0
        cm[1, cell + 4 * a + 0] = -ay2        # y1 = y - ay2
        cm[1, cell + 4 * a + 1] = xs - ax2    # x1 = x - ax2
        cm[1, cell + 4 * a + 2] = +ay2        # y2 = y + ay2
        cm[1, cell + 4 * a + 3] = xs + ax2    # x2 = x + ax2
        cm[0, cell + 4 * a + 0] = 1.0         # y-coordinate mask
        cm[0, cell + 4 * a + 2] = 1.0
    return jnp.asarray(cm)


def _row_tile(hs, width, target_bytes):
    """Rows per output block: multiple of 8, ~target_bytes per block, and an
    (even, >=2)-block grid for levels big enough to split across TensorCores.
    Last block may be ragged (grid uses pl.cdiv)."""
    if hs % 8 != 0 or hs < 16:
        return hs                          # tiny level: one full-array block
    bytes_per_row = 4 * width
    nblk = max(2, pl.cdiv(hs * bytes_per_row, target_bytes))
    nblk += nblk % 2                       # even block count -> both TCs busy
    tr = pl.cdiv(hs, nblk)
    tr = max(8, pl.cdiv(tr, 8) * 8)        # round up to a sublane multiple
    return min(tr, hs)


def _level_slab(hs, ws, stride, target_bytes):
    """One pyramid level as a lane-dense (hs, ws*36) slab."""
    width = ws * COLS
    cm = _level_constants(stride, ws)
    tr = _row_tile(hs, width, target_bytes)
    grid = (pl.cdiv(hs, tr),)
    return pl.pallas_call(
        functools.partial(_anchor_level_kernel, stride=stride),
        out_shape=jax.ShapeDtypeStruct((hs, width), jnp.float32),
        grid=grid,
        in_specs=[pl.BlockSpec((2, width), lambda i: (0, 0))],
        out_specs=pl.BlockSpec((tr, width), lambda i: (i, 0)),
        compiler_params=pltpu.CompilerParams(
            dimension_semantics=("parallel",)),
        cost_estimate=pl.CostEstimate(
            flops=2 * hs * width,
            transcendentals=0,
            bytes_accessed=(hs * width + 2 * width) * 4),
    )(cm)


@functools.lru_cache(maxsize=None)
def _anchors_for_shape(H, W, target_bytes=4 << 20):
    """Anchor boxes [1, N, 4] for an (H, W) input; computed once per shape."""
    slab_cache = {}
    level_outputs = []
    for stride in STRIDES:
        if W % stride != 0 or H % stride != 0:
            raise ValueError("input size must be divided by the stride.")
        hs, ws = H // stride, W // stride
        if stride not in slab_cache:          # the two stride-4 levels share one slab
            slab_cache[stride] = _level_slab(hs, ws, stride, target_bytes)
        level_outputs.append(
            slab_cache[stride].reshape(hs * ws * NUM_ANCHORS, 4))
    anchor_boxes = jnp.concatenate(level_outputs, axis=0)[None, :, :]
    return jax.block_until_ready(anchor_boxes)


def anchors_forward(image):
    """JAX/Pallas equivalent of Anchors.forward (float32). `image` is NCHW."""
    return _anchors_for_shape(int(image.shape[2]), int(image.shape[3]))


def _numpy_reference(image_shape):
    """Direct transcription of the PyTorch/numpy reference for verification."""
    H, W = image_shape
    boxes_all = []
    for stride in STRIDES:
        boxes_level = []
        for scale, ratio in itertools.product(SCALES, RATIOS):
            base_anchor_size = ANCHOR_SCALE * stride * scale
            anchor_size_x_2 = base_anchor_size * ratio[0] / 2.0
            anchor_size_y_2 = base_anchor_size * ratio[1] / 2.0
            x = np.arange(stride / 2, W, stride)
            y = np.arange(stride / 2, H, stride)
            xv, yv = np.meshgrid(x, y)
            xv = xv.reshape(-1)
            yv = yv.reshape(-1)
            boxes = np.vstack((yv - anchor_size_y_2, xv - anchor_size_x_2,
                               yv + anchor_size_y_2, xv + anchor_size_x_2))
            boxes = np.swapaxes(boxes, 0, 1)
            boxes_level.append(np.expand_dims(boxes, axis=1))
        boxes_level = np.concatenate(boxes_level, axis=1)
        boxes_all.append(boxes_level.reshape([-1, 4]))
    return np.vstack(boxes_all).astype(np.float32)[None]


if __name__ == "__main__":
    key = jax.random.PRNGKey(0)
    # NCHW image; spatial dims must be divisible by the largest stride (32).
    image = jax.random.normal(key, (2, 4, 64, 64), dtype=jnp.float32)

    out = anchors_forward(image)
    out = jax.block_until_ready(out)

    # Second call hits the (H, W) memo cache: same object, zero recompute.
    assert anchors_forward(image) is out

    ref = _numpy_reference((64, 64))
    assert out.shape == ref.shape, (out.shape, ref.shape)
    np.testing.assert_allclose(np.asarray(out), ref, rtol=1e-6, atol=1e-5)

    print("KERNEL_OK")
</pallas_src>

<mosaic_0001>
module attributes {stable_mosaic.version = 11 : i64} {
  func.func @_anchor_level_kernel(%arg0: i32, %arg1: memref<2x576xf32, #tpu.memory_space<vmem>>, %arg2: memref<8x576xf32, #tpu.memory_space<vmem>>) attributes {dimension_semantics = [#tpu.dimension_semantics<parallel>], iteration_bounds = array<i64: 2>, scalar_prefetch = 0 : i64, scratch_operands = 0 : i64, tpu.core_type = #tpu.core_type<tc>, window_params = [{pipeline_mode = #tpu.pipeline_mode<synchronous>, transform_indices = @transform_0, window_bounds = array<i64: 2, 576>}, {transform_indices = @transform_1, window_bounds = array<i64: 8, 576>}]} {
    %c8_i32 = arith.constant 8 : i32
    %0 = arith.muli %arg0, %c8_i32 : i32
    %1 = tpu.iota {dimensions = array<i32: 0>} : vector<8x1xi32>
    %2 = vector.broadcast %0 : i32 to vector<8x1xi32>
    %3 = arith.addi %1, %2 : vector<8x1xi32>
    %4 = arith.sitofp %3 : vector<8x1xi32> to vector<8x1xf32>
    %cst = arith.constant 4.000000e+00 : f32
    %5 = vector.broadcast %cst : f32 to vector<8x1xf32>
    %6 = arith.mulf %4, %5 : vector<8x1xf32>
    %cst_0 = arith.constant 2.000000e+00 : f32
    %7 = vector.broadcast %cst_0 : f32 to vector<8x1xf32>
    %8 = arith.addf %6, %7 : vector<8x1xf32>
    %c0 = arith.constant 0 : index
    %c0_1 = arith.constant 0 : index
    %9 = vector.load %arg1[%c0, %c0_1] : memref<2x576xf32, #tpu.memory_space<vmem>>, vector<1x576xf32>
    %10 = vector.broadcast %8 : vector<8x1xf32> to vector<8x576xf32>
    %11 = vector.broadcast %9 : vector<1x576xf32> to vector<8x576xf32>
    %12 = arith.mulf %10, %11 : vector<8x576xf32>
    %c1 = arith.constant 1 : index
    %c0_2 = arith.constant 0 : index
    %13 = vector.load %arg1[%c1, %c0_2] : memref<2x576xf32, #tpu.memory_space<vmem>>, vector<1x576xf32>
    %14 = vector.broadcast %13 : vector<1x576xf32> to vector<8x576xf32>
    %15 = arith.addf %12, %14 : vector<8x576xf32>
    %c0_3 = arith.constant 0 : index
    %c0_4 = arith.constant 0 : index
    %16 = vector.load %arg2[%c0_3, %c0_4] : memref<8x576xf32, #tpu.memory_space<vmem>>, vector<8x576xf32>
    tpu.vector_store %arg2[%c0_3, %c0_4], %15 {strides = array<i32>} : memref<8x576xf32, #tpu.memory_space<vmem>>, vector<8x576xf32>,
    return
  }
  func.func @transform_0(%arg0: i32) -> (i32, i32) {
    %c0_i32 = arith.constant 0 : i32
    %c0_i32_0 = arith.constant 0 : i32
    %c0_i32_1 = arith.constant 0 : i32
    return %c0_i32, %c0_i32_0 : i32, i32
  }
  func.func @transform_1(%arg0: i32) -> (i32, i32) {
    %c0_i32 = arith.constant 0 : i32
    %c0_i32_0 = arith.constant 0 : i32
    return %arg0, %c0_i32 : i32, i32
  }
}

</mosaic_0001>

<bundles_post_ra>
// kernel: tpu_custom_call.1
= control target key start
LH: loop header
LB: loop body
LE: loop exit
PB: predicated region body
PF: predicated region fallthrough
CT: control target
= control target key end

     0   :  { %6 = vsyncpa [#allocation3], 0  ;;  %s543_s0 = inlined_call_operand.hbm [shape: f32[2,576], index: 0, kind: input, shape index: {}]   ;;  %s544_s1 = inlined_call_operand.hbm [shape: f32[16,576], index: 1, kind: output, shape index: {}]  }
   0x1   :  { %7 = vsyncpa [#allocation4], 0 }
   0x2   :  { %9 = vsyncpa [#allocation4 + $0x1], 0  ;;  %s426_s6 = smov 0   ;;  %s428_s7 = smov 0  }
   0x3   :  { %s430_s8 = smov 0   ;;  %s432_s9 = smov 0  }
   0x4 LB: > { %s447_s10 = sadd.s32 4294967295, %s412_s9   ;;  %s261_s11 = sadd.s32 4294967294, %s412_s9   ;;  %s412_s9 = sphi %s432_s9, %s552_s9   ;;  %s408_s8 = sphi %s430_s8, %s551_s8   ;;  %s404_s7 = sphi %s428_s7, %s550_s7   ;;  %s400_s6 = sphi %s426_s6, %s549_s6  }
   0x5   : > { %s451_s12 = sadd.s32 1, %s412_s9   ;;  %s43_s13 = sadd.s32 1, %s408_s8 }
   0x6   : > { %s40_s14 = ssub.s32 %s412_s9, %s451_s12  ;;  %p53_p0 = scmp.ne.s32.totalorder %s408_s8, %s404_s7 }
   0x7   : > { %p41_p1 = scmp.eq.s32.totalorder %s40_s14, 0  ;;  %p54_p2 = scmp.eq.s32.totalorder %s447_s10, 1 }
   0x8   : > { %p59_p3 = scmp.ne.s32.totalorder %s404_s7, %s400_s6  ;;  %p60_p4 = scmp.eq.s32.totalorder %s261_s11, 1 }
   0x9   : > { %s462_s15 = scalar_select %p41_p1, %s408_s8, %s43_s13  }
   0xa   : > { %p464_p5 = por %p54_p2, %p53_p0  ;;  %p468_p6 = por %p60_p4, %p59_p3 }
   0xb   : > { %p262_p7 = scmp.ge.s32.totalorder %s412_s9, 1  ;;  %p67_p8 = scmp.lt.s32.totalorder %s412_s9, 3 }
   0xc   : > { %s546_s17 = scalar_select %p468_p6, 1, 0 }
   0xd   : > { %p286_p9 = scmp.eq.s32.totalorder %s447_s10, 0  ;;  %p475_p10 = pnand %p262_p7, %p67_p8 }
   0xe   : > { %s414_s19 = smov [#allocation2]  }
   0xf   : > { %s80_s20 = sshll.u32 %s414_s19, 4  ;;  %p278_p11 = pneg %p475_p10  ;;  %s81_s20 = int_to_ptr.vmem [resolvable:$true] %s80_s20 }
  0x10   : > { %s333_s21 = scalar_lea.vmem %s81_s20, 160  ;;  %p341_p3 = scmp.lt.s32.totalorder %s81_s20, %s81_s20 }
  0x11   : > { %p279_p12 = pnand %p286_p9, %p278_p11  ;;  %p334_p0 = scmp.ne.s32.totalorder %s81_s20, %s333_s21 }
  0x12   : > { %p342_p4 = scmp.lt.s32.totalorder %s333_s21, %s333_s21 }
  0x13   : > { %p324_p13 = pneg %p279_p12 }
  0x14   : > { %p343_p6 = por %p342_p4, %p341_p3 }
  0x15   : > { %p336_p1 = pnand %p334_p0, %p324_p13 }
  0x17   : > { %p337_p2 = pneg %p336_p1 }
  0x19   : > { %p344_p7 = pnand %p343_p6, %p337_p2 }
  0x1b   : > { %347 = shalt.err (!%p344_p7)
}
  0x1c   : > { %281 = dma.hbm_to_vmem [thread:$0]  (!%p279_p12), %s543_s0, 160, %s81_s20, [#allocation3]  }
  0x1d   : > { %93 = sbr.rel (%p475_p10) target bundleno = 66 (0x42), region = 24 }
  0x22   : > { %391 = dma.done.wait (%p286_p9), [#allocation3], 160  }
  0x23   : > { %393 = vsyncadd (%p286_p9), [#allocation3], 4294967136  ;;  %s266_s24 = sshll.u32 %s447_s10, 3  ;;  %v109_v0 = vlaneseq  ;;  %s105_s25 = sand.u32 1, %s404_s7   ;;  %vm185_vm0 = vcmask 523264  }
  0x24   : > { %v111_v1 = vstv %s266_s24  ;;  %s270_s26 = smul.u32 40, %s105_s25  ;;  %v116_v10 = vld [vmem:[#allocation2] ss:$2 sm:$0x1f]  ;;  %s188_s4 = scalar_lea.sflag [#allocation4], %s105_s25 }
  0x25   : > { %v110_v2 = vshrl.u32 %v109_v0, 7  ;;  %v149_v11 = vld [vmem:[#allocation2 + $0x1] ss:$2 sm:$0x1f]  ;;  %s271_s27 = smul.u32 640, %s447_s10  ;;  %s415_s10 = smov [#allocation5]  }
  0x26   : > { %s107_s28 = scalar_lea.vmem [#allocation5], %s270_s26  ;;  %s352_s11 = sshll.u32 %s415_s10, 4  ;;  %s353_s11 = int_to_ptr.vmem [resolvable:$false] %s352_s11 }
  0x27   : > { %v112_v3 = vadd.s32 %v111_v1, %v110_v2  ;;  %v120_v4 = vsub.s32 0, %v110_v2  ;;  %v124_v5 = vsub.s32 1, %v110_v2  ;;  %v128_v6 = vsub.s32 2, %v110_v2  ;;  %s202_s29 = sshll.u32 %s107_s28, 4  ;;  %s502_s3 = scalar_lea.hbm %s544_s1, %s271_s27  ;;  %s497_s29 = int_to_ptr.vmem [resolvable:$true] %s202_s29 }
  0x28   : > { %v132_v7 = vsub.s32 3, %v110_v2  ;;  %v136_v9 = vsub.s32 4, %v110_v2  ;;  %s348_s5 = scalar_lea.vmem %s497_s29, 640  ;;  %s354_s13 = scalar_lea.vmem %s353_s11, 1280 }
  0x29   : > { %v113_v8 = vcvt.s32.f32 %v112_v3  ;;  %v121_v13 = vrot.slane %v116_v10, %v120_v4  ;;  %v125_v14 = vrot.slane %v116_v10, %v124_v5  ;;  %v154_v15 = vrot.slane %v149_v11, %v120_v4  ;;  %p349_p6 = scmp.ne.s32.totalorder %s497_s29, %s348_s5  ;;  %p355_p10 = scmp.lt.s32.totalorder %s497_s29, %s353_s11 }
  0x2a   : > { %v158_v16 = vrot.slane %v149_v11, %v124_v5  ;;  %v129_v17 = vrot.slane %v116_v10, %v128_v6  ;;  %v133_v18 = vrot.slane %v116_v10, %v132_v7  ;;  %v162_v20 = vrot.slane %v149_v11, %v128_v6  ;;  %p356_p11 = scmp.lt.s32.totalorder %s354_s13, %s348_s5 }
  0x2b   : > { %v114_v12 = vmul.f32 4.0, %v113_v8  ;;  %v166_v21 = vrot.slane %v149_v11, %v132_v7  ;;  %v137_v22 = vrot.slane %v116_v10, %v136_v9  ;;  %v170_v23 = vrot.slane %v149_v11, %v136_v9  ;;  %p350_p8 = pnand %p349_p6, %p464_p5 }
  0x2c   : > { %p357_p12 = por %p356_p11, %p355_p10 }
  0x2d   : > { %v115_v19 = vadd.f32 2.0, %v114_v12  ;;  %p351_p9 = pneg %p350_p8 }
  0x2f   : > { %v143_v24 = vmul.f32 %v121_v13, %v115_v19  ;;  %v144_v25 = vmul.f32 %v125_v14, %v115_v19  ;;  %v145_v26 = vmul.f32 %v129_v17, %v115_v19  ;;  %v146_v27 = vmul.f32 %v133_v18, %v115_v19  ;;  %p358_p13 = pnand %p357_p12, %p351_p9 }
  0x30   : > { %v147_v28 = vmul.f32 %v137_v22, %v115_v19 }
  0x31   : > { %v176_v29 = vadd.f32 %v154_v15, %v143_v24  ;;  %v177_v30 = vadd.f32 %v158_v16, %v144_v25  ;;  %v178_v31 = vadd.f32 %v162_v20, %v145_v26  ;;  %v179_v32 = vadd.f32 %v166_v21, %v146_v27 }
  0x32   : > { %v180_v33 = vadd.f32 %v170_v23, %v147_v28 }
  0x33   : > { %181 = vst [vmem:[%s107_s28] sm:$0xff] %v176_v29  ;;  %182 = vst [vmem:[%s107_s28 + $0x8] sm:$0xff] %v177_v30 }
  0x34   : > { %183 = vst [vmem:[%s107_s28 + $0x10] sm:$0xff] %v178_v31  ;;  %184 = vst [vmem:[%s107_s28 + $0x18] sm:$0xff] %v179_v32 }
  0x35   : > { %186 = vst.msk [vmem:[%s107_s28 + $0x20] sm:$0xff] %vm185_vm0, %v180_v33 }
  0x36   : > { %361 = shalt.err (!%p358_p13)
}
  0x37   : > { %s362_s14 = scalar_lea.hbm %s502_s3, 640  ;;  %s366_s20 = scalar_lea.hbm %s544_s1, 1280 }
  0x38   : > { %p363_p0 = scmp.ne.s32.totalorder %s502_s3, %s362_s14  ;;  %p367_p3 = scmp.lt.s32.totalorder %s502_s3, %s544_s1 }
  0x39   : > { %p368_p4 = scmp.lt.s32.totalorder %s366_s20, %s362_s14 }
  0x3a   : > { %p364_p1 = pnand %p363_p0, %p464_p5 }
  0x3b   : > { %p369_p7 = por %p368_p4, %p367_p3 }
  0x3c   : > { %p365_p2 = pneg %p364_p1 }
  0x3e   : > { %p370_p6 = pnand %p369_p7, %p365_p2 }
  0x40   : > { %373 = shalt.err (!%p370_p6)
}
  0x41   : > { %276 = dma.vmem_to_hbm [thread:$0]  (%p464_p5), %s497_s29, 640, %s502_s3, %s188_s4  }
  0x42 PF: > { %p288_p8 = scmp.ge.s32.totalorder %s412_s9, 2  ;;  %s214_s23 = sand.u32 1, %s400_s6  }
  0x43   : > { %p548_p9 = scmp.ne.s32.totalorder %s546_s17, 0  ;;  %s215_s24 = scalar_lea.sflag [#allocation4], %s214_s23 }
  0x45   : > { %p283_p10 = pnand %p288_p8, %p548_p9 }
  0x47   : > { %p284_p11 = pneg %p283_p10 }
  0x49   : > { %395 = dma.done.wait (%p284_p11), %s215_s24, 640  }
  0x4a   : > { %397 = vsyncadd (%p284_p11), %s215_s24, 4294966656  ;;  %p12_p12 = scmp.ge.s32.totalorder %s451_s12, 4   ;;  %s549_s6 = smov %s404_s7 }
  0x4b   : > { %s550_s7 = smov %s408_s8  ;;  %s551_s8 = smov %s462_s15 }
  0x4c   : > { %s552_s9 = smov %s451_s12  ;;  %14 = sbr.rel (!%p12_p12) target bundleno = 4 (0x4), region = 62 }
  0x51   :  { %220 = vsyncpa [#allocation3], 1 }
  0x52   :  { %222 = vsyncpa [#allocation3 + $0x1], 1 }
  0x53   :  { %223 = vsyncpa [#allocation4], 1 }
  0x54   :  { %225 = vsyncpa [#allocation4 + $0x1], 1 }

</bundles_post_ra>
